<compile_context>
chip_gen: v6e
topology: v6e:2x2x1
jax: 0.10.0
libtpu: 0.0.40
codegen_flags: <defaults>
</compile_context>

<pallas_src>
import jax
import jax.numpy as jnp
from jax.experimental import pallas as pl
from jax.experimental.pallas import tpu as pltpu

_MIB = 1024 * 1024


# ---------------------------------------------------------------------------
# Kernel
# ---------------------------------------------------------------------------
def film_kernel(x_ref, emb_ref, ws_ref, wh_ref, bs_ref, bh_ref, o_ref):
    emb = emb_ref[...]
    # f32 MXU accumulation; b_scale already contains FiLM's "+1".
    scale = jnp.dot(emb, ws_ref[...], preferred_element_type=jnp.float32) + bs_ref[...]
    shift = jnp.dot(emb, wh_ref[...], preferred_element_type=jnp.float32) + bh_ref[...]
    x = x_ref[...]
    if x.dtype == jnp.float32:
        o_ref[...] = (x * scale + shift).astype(o_ref.dtype)
    else:
        # bf16/fp8 inputs: keep the elementwise FMA in the input dtype
        # (bf16 VALUs on v6e/v7x) instead of materializing an f32 x-tile copy.
        o_ref[...] = (
            x * scale.astype(x.dtype) + shift.astype(x.dtype)
        ).astype(o_ref.dtype)


# ---------------------------------------------------------------------------
# Parameter prep (one-time, NOT per call)
# ---------------------------------------------------------------------------
def prepare_film_params(weight, bias, n_neurons):
    """weight: [C, 2N] (pre-transposed from PyTorch's [2N, C]); bias: [2N].

    Returns (w_scale [C,N], w_shift [C,N], b_scale [1,N] with +1 folded in,
             b_shift [1,N]).
    """
    n = n_neurons
    w_scale = weight[:, :n]
    w_shift = weight[:, n:]
    b_scale = (bias[:n] + 1.0).reshape(1, n)   # fold FiLM's (scale + 1)
    b_shift = bias[n:].reshape(1, n)
    return w_scale, w_shift, b_scale, b_shift


# ---------------------------------------------------------------------------
# VMEM planning helpers
# ---------------------------------------------------------------------------
def _round_up(v, m):
    return ((v + m - 1) // m) * m


def _sublane(dtype) -> int:
    """Packed-row granularity: 8 for 32-bit, 16 for bf16, 32 for int8/fp8."""
    return max(8, 32 // jnp.dtype(dtype).itemsize)


def _tpu_vmem_capacity_bytes() -> int:
    try:
        return int(pltpu.get_tpu_info().vmem_capacity_bytes)
    except Exception:
        return 64 * _MIB  # conservative default: v7x per-TensorCore VMEM


def _pick_batch_tile(B, N, C, x_dtype, emb_dtype, resident_param_bytes,
                     vmem_limit_bytes):
    """Largest sublane-aligned batch tile whose double-buffered streaming
    blocks + resident params + f32 temps fit the VMEM plan, capped so the grid
    keeps ~8 steps (DMA overlap + v7x megacore) but tiles stay >= ~512 rows."""
    ix = jnp.dtype(x_dtype).itemsize
    ie = jnp.dtype(emb_dtype).itemsize
    sub = _sublane(x_dtype)

    if B <= sub:
        return B  # single full-extent block (block dim == full dim is legal)

    # Per-row bytes: double-buffered (x, emb, out) blocks + f32 scale/shift temps.
    per_row = 2 * (N * ix + C * ie + N * ix) + 2 * N * 4
    # Streaming-block budget: what the resident params leave, capped at ~16 MiB
    # (512-1024-row tiles already reach ~85% of HBM roofline).
    budget = min(vmem_limit_bytes - resident_param_bytes - 2 * _MIB, 16 * _MIB)
    budget = max(budget, 1 * _MIB)

    tb = max(sub, (budget // per_row) // sub * sub)

    # Prefer >= ~8 grid steps, but never shrink a tile below ~512 rows.
    tb_steps = _round_up(pl.cdiv(B, 8), sub)
    floor_tile = min(512, _round_up(B, sub))
    tb = min(tb, max(tb_steps, floor_tile))

    # Keep the block second-last dim legal: multiple of `sub`, or == B.
    cap = B if B % sub == 0 else (B // sub) * sub
    return max(sub, min(tb, cap))


# ---------------------------------------------------------------------------
# pallas_call builder + wrapper
# ---------------------------------------------------------------------------
def _build_film_call(B, N, C, TB, out_dtype, vmem_limit, cost,
                     single_buffer_params):
    # Constant-index-map operands: single-buffer them (double-buffering a
    # never-changing block is pure VMEM waste).
    resident_kw = (
        {"pipeline_mode": pl.Buffered(1)} if single_buffer_params else {}
    )
    grid = (pl.cdiv(B, TB),)
    return pl.pallas_call(
        film_kernel,
        out_shape=jax.ShapeDtypeStruct((B, N), out_dtype),
        grid_spec=pltpu.PrefetchScalarGridSpec(
            num_scalar_prefetch=0,
            grid=grid,
            in_specs=[
                pl.BlockSpec((TB, N), lambda i: (i, 0)),                 # x (tiled)
                pl.BlockSpec((TB, C), lambda i: (i, 0)),                 # emb (tiled)
                pl.BlockSpec((C, N), lambda i: (0, 0), **resident_kw),   # w_scale
                pl.BlockSpec((C, N), lambda i: (0, 0), **resident_kw),   # w_shift
                pl.BlockSpec((1, N), lambda i: (0, 0), **resident_kw),   # b_scale
                pl.BlockSpec((1, N), lambda i: (0, 0), **resident_kw),   # b_shift
            ],
            out_specs=pl.BlockSpec((TB, N), lambda i: (i, 0)),
        ),
        compiler_params=pltpu.CompilerParams(
            dimension_semantics=("parallel",),   # megacore-shardable on v7x
            vmem_limit_bytes=vmem_limit,
        ),
        cost_estimate=cost,
    )


def _film_layer_padded(in_tensor, embedded_time, w_scale, w_shift, b_scale,
                       b_shift):
    B, N = in_tensor.shape
    _, C = embedded_time.shape

    ix = jnp.dtype(in_tensor.dtype).itemsize
    ie = jnp.dtype(embedded_time.dtype).itemsize
    pw = jnp.dtype(w_scale.dtype).itemsize

    # Resident (single-buffered) weight + bias footprint.
    resident_bytes = (2 * C * N + 2 * N) * pw

    # Generation-aware VMEM limit: 3/4 of physical (64 MiB/TC on v7x,
    # 128 MiB on v5e/v6e), capped at 96 MiB.
    physical = _tpu_vmem_capacity_bytes()
    vmem_limit = min((physical * 3) // 4, 96 * _MIB)

    TB = _pick_batch_tile(B, N, C, in_tensor.dtype, embedded_time.dtype,
                          resident_bytes, vmem_limit)

    # Sanity-check the VMEM plan (double-buffered blocks + f32 temps + params).
    blocks_bytes = 2 * TB * (N * ix + C * ie + N * ix) + 2 * TB * N * 4
    assert resident_bytes + blocks_bytes + 2 * _MIB <= vmem_limit, (
        "FiLM kernel VMEM plan exceeds vmem_limit_bytes")

    cost = pl.CostEstimate(
        flops=2 * B * C * 2 * N + 3 * B * N,
        transcendentals=0,
        bytes_accessed=(B * N * ix            # in_tensor read
                        + B * C * ie          # embedded_time read
                        + resident_bytes      # weights + biases
                        + B * N * ix),        # output write
    )

    args = (in_tensor, embedded_time, w_scale, w_shift, b_scale, b_shift)
    try:
        return _build_film_call(B, N, C, TB, in_tensor.dtype, vmem_limit, cost,
                                single_buffer_params=True)(*args)
    except Exception:
        # Fallback: this jax/Mosaic build rejects buffer_count=1; use default
        # double-buffering for the resident params (correctness unchanged).
        return _build_film_call(B, N, C, TB, in_tensor.dtype, vmem_limit, cost,
                                single_buffer_params=False)(*args)


def film_layer(in_tensor, embedded_time, w_scale, w_shift, b_scale, b_shift):
    """in_tensor: [B, N], embedded_time: [B, C], w_*: [C, N], b_*: [1, N]."""
    B, N = in_tensor.shape
    _, C = embedded_time.shape
    assert w_scale.shape == (C, N) and w_shift.shape == (C, N)
    assert b_scale.shape == (1, N) and b_shift.shape == (1, N)

    # Lane-align N: a non-multiple-of-128 output last dim forces masked
    # vst.msk partial stores; pad params/x and slice the result instead.
    N_pad = _round_up(N, 128)
    if N_pad != N:
        pad = ((0, 0), (0, N_pad - N))
        in_tensor = jnp.pad(in_tensor, pad)
        w_scale = jnp.pad(w_scale, pad)
        w_shift = jnp.pad(w_shift, pad)
        b_scale = jnp.pad(b_scale, pad)
        b_shift = jnp.pad(b_shift, pad)

    out = _film_layer_padded(in_tensor, embedded_time, w_scale, w_shift,
                             b_scale, b_shift)
    return out[:, :N] if N_pad != N else out


# ---------------------------------------------------------------------------
# Pure-JAX reference
# ---------------------------------------------------------------------------
def film_reference(in_tensor, embedded_time, weight, bias):
    affine = embedded_time.astype(jnp.float32) @ weight.astype(jnp.float32) + bias
    n = in_tensor.shape[-1]
    scale, shift = affine[:, :n], affine[:, n:]
    return (in_tensor.astype(jnp.float32) * (scale + 1.0) + shift).astype(
        in_tensor.dtype
    )


if __name__ == "__main__":
    # Small, deterministic example.
    B = 16           # batch
    N = 128          # n_neurons   (multiple of 128 -> lane-aligned)
    C = 32           # n_conditional

    key = jax.random.PRNGKey(0)
    k_x, k_t, k_w, k_b = jax.random.split(key, 4)

    in_tensor = jax.random.normal(k_x, (B, N), dtype=jnp.float32)
    embedded_time = jax.random.normal(k_t, (B, C), dtype=jnp.float32)

    # Deterministic init mimicking torch.nn.Linear (uniform +/- 1/sqrt(fan_in)).
    bound = 1.0 / (C ** 0.5)
    # PyTorch weight is [2N, C]; store pre-transposed as [C, 2N].
    weight = jax.random.uniform(k_w, (C, 2 * N), jnp.float32, -bound, bound)
    bias = jax.random.uniform(k_b, (2 * N,), jnp.float32, -bound, bound)

    # One-time parameter prep: split scale/shift halves, fold +1 into b_scale.
    w_scale, w_shift, b_scale, b_shift = prepare_film_params(weight, bias, N)

    out = film_layer(in_tensor, embedded_time, w_scale, w_shift, b_scale, b_shift)
    out = jax.block_until_ready(out)

    ref = film_reference(in_tensor, embedded_time, weight, bias)
    assert out.shape == (B, N)
    assert jnp.allclose(out, ref, atol=1e-5, rtol=1e-5)

    print("KERNEL_OK")
</pallas_src>

<mosaic_0001>
module attributes {stable_mosaic.version = 11 : i64} {
  func.func @film_kernel(%arg0: i32, %arg1: memref<16x128xf32, #tpu.memory_space<vmem>>, %arg2: memref<16x32xf32, #tpu.memory_space<vmem>>, %arg3: memref<32x128xf32, #tpu.memory_space<vmem>>, %arg4: memref<32x128xf32, #tpu.memory_space<vmem>>, %arg5: memref<1x128xf32, #tpu.memory_space<vmem>>, %arg6: memref<1x128xf32, #tpu.memory_space<vmem>>, %arg7: memref<16x128xf32, #tpu.memory_space<vmem>>) attributes {dimension_semantics = [#tpu.dimension_semantics<parallel>], iteration_bounds = array<i64: 1>, scalar_prefetch = 0 : i64, scratch_operands = 0 : i64, tpu.core_type = #tpu.core_type<tc>, window_params = [{transform_indices = @transform_0, window_bounds = array<i64: 16, 128>}, {transform_indices = @transform_1, window_bounds = array<i64: 16, 32>}, {pipeline_mode = #tpu.pipeline_mode<synchronous>, transform_indices = @transform_2, window_bounds = array<i64: 32, 128>}, {pipeline_mode = #tpu.pipeline_mode<synchronous>, transform_indices = @transform_3, window_bounds = array<i64: 32, 128>}, {pipeline_mode = #tpu.pipeline_mode<synchronous>, transform_indices = @transform_4, window_bounds = array<i64: 1, 128>}, {pipeline_mode = #tpu.pipeline_mode<synchronous>, transform_indices = @transform_5, window_bounds = array<i64: 1, 128>}, {transform_indices = @transform_6, window_bounds = array<i64: 16, 128>}]} {
    %c0 = arith.constant 0 : index
    %c0_0 = arith.constant 0 : index
    %0 = vector.load %arg2[%c0, %c0_0] : memref<16x32xf32, #tpu.memory_space<vmem>>, vector<16x32xf32>
    %c0_1 = arith.constant 0 : index
    %c0_2 = arith.constant 0 : index
    %1 = vector.load %arg3[%c0_1, %c0_2] : memref<32x128xf32, #tpu.memory_space<vmem>>, vector<32x128xf32>
    %cst = arith.constant dense<0.000000e+00> : vector<16x128xf32>
    %2 = tpu.matmul %0, %1, %cst {dimension_numbers = #tpu.dot_dimension_numbers<[1], [0], [0], [1], [0, 0, 1, 1], [], []>} : vector<16x32xf32>, vector<32x128xf32>, vector<16x128xf32> -> vector<16x128xf32>
    %c0_3 = arith.constant 0 : index
    %c0_4 = arith.constant 0 : index
    %3 = vector.load %arg5[%c0_3, %c0_4] : memref<1x128xf32, #tpu.memory_space<vmem>>, vector<1x128xf32>
    %4 = vector.broadcast %3 : vector<1x128xf32> to vector<16x128xf32>
    %5 = arith.addf %2, %4 : vector<16x128xf32>
    %c0_5 = arith.constant 0 : index
    %c0_6 = arith.constant 0 : index
    %6 = vector.load %arg4[%c0_5, %c0_6] : memref<32x128xf32, #tpu.memory_space<vmem>>, vector<32x128xf32>
    %cst_7 = arith.constant dense<0.000000e+00> : vector<16x128xf32>
    %7 = tpu.matmul %0, %6, %cst_7 {dimension_numbers = #tpu.dot_dimension_numbers<[1], [0], [0], [1], [0, 0, 1, 1], [], []>} : vector<16x32xf32>, vector<32x128xf32>, vector<16x128xf32> -> vector<16x128xf32>
    %c0_8 = arith.constant 0 : index
    %c0_9 = arith.constant 0 : index
    %8 = vector.load %arg6[%c0_8, %c0_9] : memref<1x128xf32, #tpu.memory_space<vmem>>, vector<1x128xf32>
    %9 = vector.broadcast %8 : vector<1x128xf32> to vector<16x128xf32>
    %10 = arith.addf %7, %9 : vector<16x128xf32>
    %c0_10 = arith.constant 0 : index
    %c0_11 = arith.constant 0 : index
    %11 = vector.load %arg1[%c0_10, %c0_11] : memref<16x128xf32, #tpu.memory_space<vmem>>, vector<16x128xf32>
    %12 = arith.mulf %11, %5 : vector<16x128xf32>
    %13 = arith.addf %12, %10 : vector<16x128xf32>
    %c0_12 = arith.constant 0 : index
    %c0_13 = arith.constant 0 : index
    %14 = vector.load %arg7[%c0_12, %c0_13] : memref<16x128xf32, #tpu.memory_space<vmem>>, vector<16x128xf32>
    tpu.vector_store %arg7[%c0_12, %c0_13], %13 {strides = array<i32>} : memref<16x128xf32, #tpu.memory_space<vmem>>, vector<16x128xf32>,
    return
  }
  func.func @transform_0(%arg0: i32) -> (i32, i32) {
    %c0_i32 = arith.constant 0 : i32
    %c0_i32_0 = arith.constant 0 : i32
    return %arg0, %c0_i32 : i32, i32
  }
  func.func @transform_1(%arg0: i32) -> (i32, i32) {
    %c0_i32 = arith.constant 0 : i32
    %c0_i32_0 = arith.constant 0 : i32
    return %arg0, %c0_i32 : i32, i32
  }
  func.func @transform_2(%arg0: i32) -> (i32, i32) {
    %c0_i32 = arith.constant 0 : i32
    %c0_i32_0 = arith.constant 0 : i32
    %c0_i32_1 = arith.constant 0 : i32
    return %c0_i32, %c0_i32_0 : i32, i32
  }
  func.func @transform_3(%arg0: i32) -> (i32, i32) {
    %c0_i32 = arith.constant 0 : i32
    %c0_i32_0 = arith.constant 0 : i32
    %c0_i32_1 = arith.constant 0 : i32
    return %c0_i32, %c0_i32_0 : i32, i32
  }
  func.func @transform_4(%arg0: i32) -> (i32, i32) {
    %c0_i32 = arith.constant 0 : i32
    %c0_i32_0 = arith.constant 0 : i32
    %c0_i32_1 = arith.constant 0 : i32
    return %c0_i32, %c0_i32_0 : i32, i32
  }
  func.func @transform_5(%arg0: i32) -> (i32, i32) {
    %c0_i32 = arith.constant 0 : i32
    %c0_i32_0 = arith.constant 0 : i32
    %c0_i32_1 = arith.constant 0 : i32
    return %c0_i32, %c0_i32_0 : i32, i32
  }
  func.func @transform_6(%arg0: i32) -> (i32, i32) {
    %c0_i32 = arith.constant 0 : i32
    %c0_i32_0 = arith.constant 0 : i32
    return %arg0, %c0_i32 : i32, i32
  }
}

module attributes {stable_mosaic.version = 11 : i64} {
  func.func @film_kernel(%arg0: i32, %arg1: memref<16x128xf32, #tpu.memory_space<vmem>>, %arg2: memref<16x32xf32, #tpu.memory_space<vmem>>, %arg3: memref<32x128xf32, #tpu.memory_space<vmem>>, %arg4: memref<32x128xf32, #tpu.memory_space<vmem>>, %arg5: memref<1x128xf32, #tpu.memory_space<vmem>>, %arg6: memref<1x128xf32, #tpu.memory_space<vmem>>, %arg7: memref<16x128xf32, #tpu.memory_space<vmem>>) attributes {dimension_semantics = [#tpu.dimension_semantics<parallel>], iteration_bounds = array<i64: 1>, scalar_prefetch = 0 : i64, scratch_operands = 0 : i64, tpu.core_type = #tpu.core_type<tc>, window_params = [{transform_indices = @transform_0, window_bounds = array<i64: 16, 128>}, {transform_indices = @transform_1, window_bounds = array<i64: 16, 32>}, {pipeline_mode = #tpu.pipeline_mode<synchronous>, transform_indices = @transform_2, window_bounds = array<i64: 32, 128>}, {pipeline_mode = #tpu.pipeline_mode<synchronous>, transform_indices = @transform_3, window_bounds = array<i64: 32, 128>}, {pipeline_mode = #tpu.pipeline_mode<synchronous>, transform_indices = @transform_4, window_bounds = array<i64: 1, 128>}, {pipeline_mode = #tpu.pipeline_mode<synchronous>, transform_indices = @transform_5, window_bounds = array<i64: 1, 128>}, {transform_indices = @transform_6, window_bounds = array<i64: 16, 128>}]} {
    %c0 = arith.constant 0 : index
    %c0_0 = arith.constant 0 : index
    %0 = vector.load %arg2[%c0, %c0_0] : memref<16x32xf32, #tpu.memory_space<vmem>>, vector<16x32xf32>
    %c0_1 = arith.constant 0 : index
    %c0_2 = arith.constant 0 : index
    %1 = vector.load %arg3[%c0_1, %c0_2] : memref<32x128xf32, #tpu.memory_space<vmem>>, vector<32x128xf32>
    %cst = arith.constant dense<0.000000e+00> : vector<16x128xf32>
    %2 = tpu.matmul %0, %1, %cst {dimension_numbers = #tpu.dot_dimension_numbers<[1], [0], [0], [1], [0, 0, 1, 1], [], []>} : vector<16x32xf32>, vector<32x128xf32>, vector<16x128xf32> -> vector<16x128xf32>
    %c0_3 = arith.constant 0 : index
    %c0_4 = arith.constant 0 : index
    %3 = vector.load %arg5[%c0_3, %c0_4] : memref<1x128xf32, #tpu.memory_space<vmem>>, vector<1x128xf32>
    %4 = vector.broadcast %3 : vector<1x128xf32> to vector<16x128xf32>
    %5 = arith.addf %2, %4 : vector<16x128xf32>
    %c0_5 = arith.constant 0 : index
    %c0_6 = arith.constant 0 : index
    %6 = vector.load %arg4[%c0_5, %c0_6] : memref<32x128xf32, #tpu.memory_space<vmem>>, vector<32x128xf32>
    %cst_7 = arith.constant dense<0.000000e+00> : vector<16x128xf32>
    %7 = tpu.matmul %0, %6, %cst_7 {dimension_numbers = #tpu.dot_dimension_numbers<[1], [0], [0], [1], [0, 0, 1, 1], [], []>} : vector<16x32xf32>, vector<32x128xf32>, vector<16x128xf32> -> vector<16x128xf32>
    %c0_8 = arith.constant 0 : index
    %c0_9 = arith.constant 0 : index
    %8 = vector.load %arg6[%c0_8, %c0_9] : memref<1x128xf32, #tpu.memory_space<vmem>>, vector<1x128xf32>
    %9 = vector.broadcast %8 : vector<1x128xf32> to vector<16x128xf32>
    %10 = arith.addf %7, %9 : vector<16x128xf32>
    %c0_10 = arith.constant 0 : index
    %c0_11 = arith.constant 0 : index
    %11 = vector.load %arg1[%c0_10, %c0_11] : memref<16x128xf32, #tpu.memory_space<vmem>>, vector<16x128xf32>
    %12 = arith.mulf %11, %5 : vector<16x128xf32>
    %13 = arith.addf %12, %10 : vector<16x128xf32>
    %c0_12 = arith.constant 0 : index
    %c0_13 = arith.constant 0 : index
    %14 = vector.load %arg7[%c0_12, %c0_13] : memref<16x128xf32, #tpu.memory_space<vmem>>, vector<16x128xf32>
    tpu.vector_store %arg7[%c0_12, %c0_13], %13 {strides = array<i32>} : memref<16x128xf32, #tpu.memory_space<vmem>>, vector<16x128xf32>,
    return
  }
  func.func @transform_0(%arg0: i32) -> (i32, i32) {
    %c0_i32 = arith.constant 0 : i32
    %c0_i32_0 = arith.constant 0 : i32
    return %arg0, %c0_i32 : i32, i32
  }
  func.func @transform_1(%arg0: i32) -> (i32, i32) {
    %c0_i32 = arith.constant 0 : i32
    %c0_i32_0 = arith.constant 0 : i32
    return %arg0, %c0_i32 : i32, i32
  }
  func.func @transform_2(%arg0: i32) -> (i32, i32) {
    %c0_i32 = arith.constant 0 : i32
    %c0_i32_0 = arith.constant 0 : i32
    %c0_i32_1 = arith.constant 0 : i32
    return %c0_i32, %c0_i32_0 : i32, i32
  }
  func.func @transform_3(%arg0: i32) -> (i32, i32) {
    %c0_i32 = arith.constant 0 : i32
    %c0_i32_0 = arith.constant 0 : i32
    %c0_i32_1 = arith.constant 0 : i32
    return %c0_i32, %c0_i32_0 : i32, i32
  }
  func.func @transform_4(%arg0: i32) -> (i32, i32) {
    %c0_i32 = arith.constant 0 : i32
    %c0_i32_0 = arith.constant 0 : i32
    %c0_i32_1 = arith.constant 0 : i32
    return %c0_i32, %c0_i32_0 : i32, i32
  }
  func.func @transform_5(%arg0: i32) -> (i32, i32) {
    %c0_i32 = arith.constant 0 : i32
    %c0_i32_0 = arith.constant 0 : i32
    %c0_i32_1 = arith.constant 0 : i32
    return %c0_i32, %c0_i32_0 : i32, i32
  }
  func.func @transform_6(%arg0: i32) -> (i32, i32) {
    %c0_i32 = arith.constant 0 : i32
    %c0_i32_0 = arith.constant 0 : i32
    return %arg0, %c0_i32 : i32, i32
  }
}

</mosaic_0001>

<bundles_post_ra>
// kernel: tpu_custom_call.1
= control target key start
LH: loop header
LB: loop body
LE: loop exit
PB: predicated region body
PF: predicated region fallthrough
CT: control target
= control target key end

     0   :  { %11 = vsyncpa [#allocation3], 0  ;;  %s520_s0 = inlined_call_operand.hbm [shape: f32[16,128], index: 0, kind: input, shape index: {}]   ;;  %s521_s1 = inlined_call_operand.hbm [shape: f32[16,32], index: 1, kind: input, shape index: {}]   ;;  %s522_s2 = inlined_call_operand.hbm [shape: f32[32,128], index: 2, kind: input, shape index: {}]   ;;  %s523_s3 = inlined_call_operand.hbm [shape: f32[32,128], index: 3, kind: input, shape index: {}]   ;;  %s524_s4 = inlined_call_operand.vmem [shape: f32[1,128], index: 4, kind: input, shape index: {}]   ;;  %s525_s5 = inlined_call_operand.vmem [shape: f32[1,128], index: 5, kind: input, shape index: {}]   ;;  %s526_s6 = inlined_call_operand.hbm [shape: f32[16,128], index: 6, kind: output, shape index: {}]  }
   0x1   :  { %12 = vsyncpa [#allocation6], 0 }
   0x2   :  { %13 = vsyncpa [#allocation9], 0 }
   0x3   :  { %14 = vsyncpa [#allocation4], 0  ;;  %s442_s21 = smov [#allocation5]   ;;  %s443_s23 = smov [#allocation2]  }
   0x4   :  { %s32_s22 = sshll.u32 %s442_s21, 4  ;;  %s20_s24 = sshll.u32 %s443_s23, 4  ;;  %s33_s22 = int_to_ptr.vmem [resolvable:$true] %s32_s22  ;;  %s21_s24 = int_to_ptr.vmem [resolvable:$true] %s20_s24 }
   0x5   :  { %s342_s25 = scalar_lea.vmem %s33_s22, 256  ;;  %p347_p1 = scmp.lt.s32.totalorder %s33_s22, %s33_s22 }
   0x6   :  { %p343_p0 = scmp.ne.s32.totalorder %s33_s22, %s342_s25  ;;  %p348_p2 = scmp.lt.s32.totalorder %s342_s25, %s342_s25 }
   0x8   :  { %p349_p3 = por %p348_p2, %p347_p1 }
   0xa   :  { %p350_p4 = pnand %p349_p3, %p343_p0 }
   0xc   :  { %353 = shalt.err (!%p350_p4)
}
   0xd   :  { %s444_s26 = smov 128   ;;  %s445_s27 = smov 8  }
   0xe   :  { %38 = dma.hbm_to_vmem [thread:$0]  %s521_s1, 256, %s33_s22, [#allocation6], %s444_s26, %s444_s26, %s445_s27  }
   0xf   :  { %s362_s30 = scalar_lea.vmem %s21_s24, 256  ;;  %p367_p6 = scmp.lt.s32.totalorder %s21_s24, %s21_s24 }
  0x10   :  { %p363_p5 = scmp.ne.s32.totalorder %s21_s24, %s362_s30  ;;  %p368_p7 = scmp.lt.s32.totalorder %s362_s30, %s362_s30 }
  0x12   :  { %p369_p8 = por %p368_p7, %p367_p6 }
  0x14   :  { %p370_p9 = pnand %p369_p8, %p363_p5 }
  0x16   :  { %373 = shalt.err (!%p370_p9)
}
  0x17   :  { %26 = dma.hbm_to_vmem [thread:$0]  %s520_s0, 256, %s21_s24, [#allocation3], %s444_s26, %s444_s26, %s445_s27  }
  0x18   :  { %s446_s9 = smov [#allocation7]   ;;  %s447_s11 = smov [#allocation8]  }
  0x19   :  { %s44_s10 = sshll.u32 %s446_s9, 4  ;;  %s56_s12 = sshll.u32 %s447_s11, 4  ;;  %s45_s10 = int_to_ptr.vmem [resolvable:$true] %s44_s10  ;;  %s57_s12 = int_to_ptr.vmem [resolvable:$true] %s56_s12 }
  0x1a   :  { %s382_s1 = scalar_lea.vmem %s45_s10, 512  ;;  %p387_p11 = scmp.lt.s32.totalorder %s45_s10, %s45_s10 }
  0x1b   :  { %p383_p10 = scmp.ne.s32.totalorder %s45_s10, %s382_s1  ;;  %p388_p12 = scmp.lt.s32.totalorder %s382_s1, %s382_s1 }
  0x1d   :  { %p389_p13 = por %p388_p12, %p387_p11 }
  0x1f   :  { %p390_p0 = pnand %p389_p13, %p383_p10 }
  0x21   :  { %393 = shalt.err (!%p390_p0)
}
  0x22   :  { %50 = dma.hbm_to_vmem [thread:$0]  %s522_s2, 512, %s45_s10, [#allocation6], %s444_s26, %s444_s26, %s445_s27  }
  0x23   :  { %s402_s0 = scalar_lea.vmem %s57_s12, 512  ;;  %p407_p2 = scmp.lt.s32.totalorder %s57_s12, %s57_s12 }
  0x24   :  { %p403_p1 = scmp.ne.s32.totalorder %s57_s12, %s402_s0  ;;  %p408_p3 = scmp.lt.s32.totalorder %s402_s0, %s402_s0 }
  0x26   :  { %p409_p4 = por %p408_p3, %p407_p2 }
  0x28   :  { %p410_p5 = pnand %p409_p4, %p403_p1 }
  0x2a   :  { %413 = shalt.err (!%p410_p5)
}
  0x2b   :  { %62 = dma.hbm_to_vmem [thread:$0]  %s523_s3, 512, %s57_s12, [#allocation9], %s444_s26, %s444_s26, %s445_s27  }
  0x2c   :  { %434 = dma.done.wait [#allocation3], 256  }
  0x2d   :  { %435 = vsyncadd [#allocation3], 4294967040 }
  0x2e   :  { %436 = dma.done.wait [#allocation6], 768  }
  0x2f   :  { %437 = vsyncadd [#allocation6], 4294966528 }
  0x30   :  { %438 = dma.done.wait [#allocation9], 512  }
  0x31   :  { %439 = vsyncadd [#allocation9], 4294966784  ;;  %v84_v0 = vld [vmem:[#allocation7 + $0x18] sm:$0xff]  ;;  %v83_v2 = vld [vmem:[#allocation7 + $0x10] sm:$0xff]  ;;  %vm92_vm0 = vcmask 261120   ;;  %s448_s19 = smov [#allocation10]  }
  0x32   :  { %v177_v1 = vld [vmem:[#allocation8 + $0x18] sm:$0xff]  ;;  %305 = vmatprep.subr.mxu0 %v84_v0  ;;  %v176_v3 = vld [vmem:[#allocation8 + $0x10] sm:$0xff]  ;;  %v82_v4 = vld [vmem:[#allocation7 + $0x8] sm:$0xff]  ;;  %s273_s20 = sshll.u32 %s448_s19, 4  ;;  %s274_s20 = int_to_ptr.vmem [resolvable:$true] %s273_s20 }
  0x33   :  { %316 = vmatprep.subr.mxu1 %v177_v1  ;;  %306 = vmatpush3.msra.mxu0 %v84_v0  ;;  %v175_v5 = vld [vmem:[#allocation8 + $0x8] sm:$0xff]  ;;  %v81_v6 = vld [vmem:[#allocation7] sm:$0xff]  ;;  %v79_v8 = vld [vmem:[#allocation5] sm:$0xff]  ;;  %p419_p7 = scmp.lt.s32.totalorder %s274_s20, %s274_s20 }
  0x34   :  { %317 = vmatpush3.msra.mxu1 %v177_v1  ;;  %307 = vmatprep.subr.mxu0 %v83_v2  ;;  %v174_v7 = vld [vmem:[#allocation8] sm:$0xff]  ;;  %v80_v9 = vld [vmem:[#allocation5 + $0x8] sm:$0xff]  ;;  %v261_v13 = vld [vmem:[#allocation2 + $0x8] sm:$0xff] }
  0x35   :  { %318 = vmatprep.subr.mxu1 %v176_v3  ;;  %308 = vmatpush3.msra.mxu0 %v83_v2  ;;  %v287_v10 = vld [vmem:[%s524_s4] ss:$0 sm:$0xff]  ;;  %s414_s4 = scalar_lea.vmem %s274_s20, 256 }
  0x36   :  { %319 = vmatpush3.msra.mxu1 %v176_v3  ;;  %309 = vmatprep.subr.mxu0 %v82_v4  ;;  %v290_v11 = vld [vmem:[%s525_s5] ss:$0 sm:$0xff]  ;;  %p415_p6 = scmp.ne.s32.totalorder %s274_s20, %s414_s4  ;;  %p420_p8 = scmp.lt.s32.totalorder %s414_s4, %s414_s4 }
  0x37   :  { %320 = vmatprep.subr.mxu1 %v175_v5  ;;  %310 = vmatpush3.msra.mxu0 %v82_v4  ;;  %v260_v18 = vld [vmem:[#allocation2] sm:$0xff] }
  0x38   :  { %321 = vmatpush3.msra.mxu1 %v175_v5  ;;  %311 = vmatprep.subr.mxu0 %v81_v6  ;;  %p421_p9 = por %p420_p8, %p419_p7 }
  0x39   :  { %322 = vmatprep.subr.mxu1 %v174_v7  ;;  %312 = vmatpush3.msra.mxu0 %v81_v6 }
  0x3a   :  { %313 = vmatprep.mubr.msk.f32.mxu0 %vm92_vm0, %v79_v8  ;;  %323 = vmatpush3.msra.mxu1 %v174_v7  ;;  %p422_p10 = pnand %p421_p9, %p415_p6 }
  0x3b   :  { %324 = vmatprep.mubr.msk.f32.mxu1 %vm92_vm0, %v79_v8  ;;  %314 = vmatmul.mubr.msk.f32.vlgmr.msra.gmra.mxu0 %vm92_vm0, %v80_v9 }
  0x3c   :  { %325 = vmatmul.mubr.msk.f32.vlgmr.msra.gmra.mxu1 %vm92_vm0, %v80_v9 }
  0xfb   :  { %v315_v12 = vpop.f32.mrf.mxu0 }
  0xfc   :  { %v326_v14 = vpop.f32.mrf.mxu1  ;;  %v171_v15 = vadd.f32 %v315_v12, %v287_v10 }
  0xfd   :  { %v257_v16 = vadd.f32 %v326_v14, %v290_v11  ;;  %v165_v17 = vpop.f32.mrf.mxu0 }
  0xfe   :  { %v251_v19 = vpop.f32.mrf.mxu1  ;;  %v263_v20 = vmul.f32 %v261_v13, %v171_v15  ;;  %v166_v21 = vadd.f32 %v287_v10, %v165_v17 }
  0xff   :  { %v252_v24 = vadd.f32 %v290_v11, %v251_v19 }
 0x100   :  { %v265_v22 = vadd.f32 %v263_v20, %v257_v16  ;;  %v262_v23 = vmul.f32 %v260_v18, %v166_v21 }
 0x102   :  { %267 = vst [vmem:[#allocation10 + $0x8] sm:$0xff] %v265_v22  ;;  %v264_v25 = vadd.f32 %v262_v23, %v252_v24 }
 0x104   :  { %266 = vst [vmem:[#allocation10] sm:$0xff] %v264_v25 }
 0x105   :  { %425 = shalt.err (!%p422_p10)
}
 0x106   :  { %279 = dma.vmem_to_hbm [thread:$0]  %s274_s20, 256, %s526_s6, [#allocation4], %s444_s26, %s444_s26, %s445_s27  }
 0x107   :  { %440 = dma.done.wait [#allocation4], 256  }
 0x108   :  { %441 = vsyncadd [#allocation4], 4294967040 }
 0x109   :  { %283 = vsyncpa [#allocation3], 1 }
 0x10a   :  { %284 = vsyncpa [#allocation6], 1 }
 0x10b   :  { %285 = vsyncpa [#allocation9], 1 }
 0x10c   :  { %286 = vsyncpa [#allocation4], 1 }

// kernel: tpu_custom_call.1
= control target key start
LH: loop header
LB: loop body
LE: loop exit
PB: predicated region body
PF: predicated region fallthrough
CT: control target
= control target key end

     0   :  { %11 = vsyncpa [#allocation3], 0  ;;  %s520_s0 = inlined_call_operand.hbm [shape: f32[16,128], index: 0, kind: input, shape index: {}]   ;;  %s521_s1 = inlined_call_operand.hbm [shape: f32[16,32], index: 1, kind: input, shape index: {}]   ;;  %s522_s2 = inlined_call_operand.hbm [shape: f32[32,128], index: 2, kind: input, shape index: {}]   ;;  %s523_s3 = inlined_call_operand.hbm [shape: f32[32,128], index: 3, kind: input, shape index: {}]   ;;  %s524_s4 = inlined_call_operand.vmem [shape: f32[1,128], index: 4, kind: input, shape index: {}]   ;;  %s525_s5 = inlined_call_operand.vmem [shape: f32[1,128], index: 5, kind: input, shape index: {}]   ;;  %s526_s6 = inlined_call_operand.hbm [shape: f32[16,128], index: 6, kind: output, shape index: {}]  }
   0x1   :  { %12 = vsyncpa [#allocation6], 0 }
   0x2   :  { %13 = vsyncpa [#allocation9], 0 }
   0x3   :  { %14 = vsyncpa [#allocation4], 0  ;;  %s442_s21 = smov [#allocation5]   ;;  %s443_s23 = smov [#allocation2]  }
   0x4   :  { %s32_s22 = sshll.u32 %s442_s21, 4  ;;  %s20_s24 = sshll.u32 %s443_s23, 4  ;;  %s33_s22 = int_to_ptr.vmem [resolvable:$true] %s32_s22  ;;  %s21_s24 = int_to_ptr.vmem [resolvable:$true] %s20_s24 }
   0x5   :  { %s342_s25 = scalar_lea.vmem %s33_s22, 256  ;;  %p347_p1 = scmp.lt.s32.totalorder %s33_s22, %s33_s22 }
   0x6   :  { %p343_p0 = scmp.ne.s32.totalorder %s33_s22, %s342_s25  ;;  %p348_p2 = scmp.lt.s32.totalorder %s342_s25, %s342_s25 }
   0x8   :  { %p349_p3 = por %p348_p2, %p347_p1 }
   0xa   :  { %p350_p4 = pnand %p349_p3, %p343_p0 }
   0xc   :  { %353 = shalt.err (!%p350_p4)
}
   0xd   :  { %s444_s26 = smov 128   ;;  %s445_s27 = smov 8  }
   0xe   :  { %38 = dma.hbm_to_vmem [thread:$0]  %s521_s1, 256, %s33_s22, [#allocation6], %s444_s26, %s444_s26, %s445_s27  }
   0xf   :  { %s362_s30 = scalar_lea.vmem %s21_s24, 256  ;;  %p367_p6 = scmp.lt.s32.totalorder %s21_s24, %s21_s24 }
  0x10   :  { %p363_p5 = scmp.ne.s32.totalorder %s21_s24, %s362_s30  ;;  %p368_p7 = scmp.lt.s32.totalorder %s362_s30, %s362_s30 }
  0x12   :  { %p369_p8 = por %p368_p7, %p367_p6 }
  0x14   :  { %p370_p9 = pnand %p369_p8, %p363_p5 }
  0x16   :  { %373 = shalt.err (!%p370_p9)
}
  0x17   :  { %26 = dma.hbm_to_vmem [thread:$0]  %s520_s0, 256, %s21_s24, [#allocation3], %s444_s26, %s444_s26, %s445_s27  }
  0x18   :  { %s446_s9 = smov [#allocation7]   ;;  %s447_s11 = smov [#allocation8]  }
  0x19   :  { %s44_s10 = sshll.u32 %s446_s9, 4  ;;  %s56_s12 = sshll.u32 %s447_s11, 4  ;;  %s45_s10 = int_to_ptr.vmem [resolvable:$true] %s44_s10  ;;  %s57_s12 = int_to_ptr.vmem [resolvable:$true] %s56_s12 }
  0x1a   :  { %s382_s1 = scalar_lea.vmem %s45_s10, 512  ;;  %p387_p11 = scmp.lt.s32.totalorder %s45_s10, %s45_s10 }
  0x1b   :  { %p383_p10 = scmp.ne.s32.totalorder %s45_s10, %s382_s1  ;;  %p388_p12 = scmp.lt.s32.totalorder %s382_s1, %s382_s1 }
  0x1d   :  { %p389_p13 = por %p388_p12, %p387_p11 }
  0x1f   :  { %p390_p0 = pnand %p389_p13, %p383_p10 }
  0x21   :  { %393 = shalt.err (!%p390_p0)
}
  0x22   :  { %50 = dma.hbm_to_vmem [thread:$0]  %s522_s2, 512, %s45_s10, [#allocation6], %s444_s26, %s444_s26, %s445_s27  }
  0x23   :  { %s402_s0 = scalar_lea.vmem %s57_s12, 512  ;;  %p407_p2 = scmp.lt.s32.totalorder %s57_s12, %s57_s12 }
  0x24   :  { %p403_p1 = scmp.ne.s32.totalorder %s57_s12, %s402_s0  ;;  %p408_p3 = scmp.lt.s32.totalorder %s402_s0, %s402_s0 }
  0x26   :  { %p409_p4 = por %p408_p3, %p407_p2 }
  0x28   :  { %p410_p5 = pnand %p409_p4, %p403_p1 }
  0x2a   :  { %413 = shalt.err (!%p410_p5)
}
  0x2b   :  { %62 = dma.hbm_to_vmem [thread:$0]  %s523_s3, 512, %s57_s12, [#allocation9], %s444_s26, %s444_s26, %s445_s27  }
  0x2c   :  { %434 = dma.done.wait [#allocation3], 256  }
  0x2d   :  { %435 = vsyncadd [#allocation3], 4294967040 }
  0x2e   :  { %436 = dma.done.wait [#allocation6], 768  }
  0x2f   :  { %437 = vsyncadd [#allocation6], 4294966528 }
  0x30   :  { %438 = dma.done.wait [#allocation9], 512  }
  0x31   :  { %439 = vsyncadd [#allocation9], 4294966784  ;;  %v84_v0 = vld [vmem:[#allocation7 + $0x18] sm:$0xff]  ;;  %v83_v2 = vld [vmem:[#allocation7 + $0x10] sm:$0xff]  ;;  %vm92_vm0 = vcmask 261120   ;;  %s448_s19 = smov [#allocation10]  }
  0x32   :  { %v177_v1 = vld [vmem:[#allocation8 + $0x18] sm:$0xff]  ;;  %305 = vmatprep.subr.mxu0 %v84_v0  ;;  %v176_v3 = vld [vmem:[#allocation8 + $0x10] sm:$0xff]  ;;  %v82_v4 = vld [vmem:[#allocation7 + $0x8] sm:$0xff]  ;;  %s273_s20 = sshll.u32 %s448_s19, 4  ;;  %s274_s20 = int_to_ptr.vmem [resolvable:$true] %s273_s20 }
  0x33   :  { %316 = vmatprep.subr.mxu1 %v177_v1  ;;  %306 = vmatpush3.msra.mxu0 %v84_v0  ;;  %v175_v5 = vld [vmem:[#allocation8 + $0x8] sm:$0xff]  ;;  %v81_v6 = vld [vmem:[#allocation7] sm:$0xff]  ;;  %v79_v8 = vld [vmem:[#allocation5] sm:$0xff]  ;;  %p419_p7 = scmp.lt.s32.totalorder %s274_s20, %s274_s20 }
  0x34   :  { %317 = vmatpush3.msra.mxu1 %v177_v1  ;;  %307 = vmatprep.subr.mxu0 %v83_v2  ;;  %v174_v7 = vld [vmem:[#allocation8] sm:$0xff]  ;;  %v80_v9 = vld [vmem:[#allocation5 + $0x8] sm:$0xff]  ;;  %v261_v13 = vld [vmem:[#allocation2 + $0x8] sm:$0xff] }
  0x35   :  { %318 = vmatprep.subr.mxu1 %v176_v3  ;;  %308 = vmatpush3.msra.mxu0 %v83_v2  ;;  %v287_v10 = vld [vmem:[%s524_s4] ss:$0 sm:$0xff]  ;;  %s414_s4 = scalar_lea.vmem %s274_s20, 256 }
  0x36   :  { %319 = vmatpush3.msra.mxu1 %v176_v3  ;;  %309 = vmatprep.subr.mxu0 %v82_v4  ;;  %v290_v11 = vld [vmem:[%s525_s5] ss:$0 sm:$0xff]  ;;  %p415_p6 = scmp.ne.s32.totalorder %s274_s20, %s414_s4  ;;  %p420_p8 = scmp.lt.s32.totalorder %s414_s4, %s414_s4 }
  0x37   :  { %320 = vmatprep.subr.mxu1 %v175_v5  ;;  %310 = vmatpush3.msra.mxu0 %v82_v4  ;;  %v260_v18 = vld [vmem:[#allocation2] sm:$0xff] }
  0x38   :  { %321 = vmatpush3.msra.mxu1 %v175_v5  ;;  %311 = vmatprep.subr.mxu0 %v81_v6  ;;  %p421_p9 = por %p420_p8, %p419_p7 }
  0x39   :  { %322 = vmatprep.subr.mxu1 %v174_v7  ;;  %312 = vmatpush3.msra.mxu0 %v81_v6 }
  0x3a   :  { %313 = vmatprep.mubr.msk.f32.mxu0 %vm92_vm0, %v79_v8  ;;  %323 = vmatpush3.msra.mxu1 %v174_v7  ;;  %p422_p10 = pnand %p421_p9, %p415_p6 }
  0x3b   :  { %324 = vmatprep.mubr.msk.f32.mxu1 %vm92_vm0, %v79_v8  ;;  %314 = vmatmul.mubr.msk.f32.vlgmr.msra.gmra.mxu0 %vm92_vm0, %v80_v9 }
  0x3c   :  { %325 = vmatmul.mubr.msk.f32.vlgmr.msra.gmra.mxu1 %vm92_vm0, %v80_v9 }
  0xfb   :  { %v315_v12 = vpop.f32.mrf.mxu0 }
  0xfc   :  { %v326_v14 = vpop.f32.mrf.mxu1  ;;  %v171_v15 = vadd.f32 %v315_v12, %v287_v10 }
  0xfd   :  { %v257_v16 = vadd.f32 %v326_v14, %v290_v11  ;;  %v165_v17 = vpop.f32.mrf.mxu0 }
  0xfe   :  { %v251_v19 = vpop.f32.mrf.mxu1  ;;  %v263_v20 = vmul.f32 %v261_v13, %v171_v15  ;;  %v166_v21 = vadd.f32 %v287_v10, %v165_v17 }
  0xff   :  { %v252_v24 = vadd.f32 %v290_v11, %v251_v19 }
 0x100   :  { %v265_v22 = vadd.f32 %v263_v20, %v257_v16  ;;  %v262_v23 = vmul.f32 %v260_v18, %v166_v21 }
 0x102   :  { %267 = vst [vmem:[#allocation10 + $0x8] sm:$0xff] %v265_v22  ;;  %v264_v25 = vadd.f32 %v262_v23, %v252_v24 }
 0x104   :  { %266 = vst [vmem:[#allocation10] sm:$0xff] %v264_v25 }
 0x105   :  { %425 = shalt.err (!%p422_p10)
}
 0x106   :  { %279 = dma.vmem_to_hbm [thread:$0]  %s274_s20, 256, %s526_s6, [#allocation4], %s444_s26, %s444_s26, %s445_s27  }
 0x107   :  { %440 = dma.done.wait [#allocation4], 256  }
 0x108   :  { %441 = vsyncadd [#allocation4], 4294967040 }
 0x109   :  { %283 = vsyncpa [#allocation3], 1 }
 0x10a   :  { %284 = vsyncpa [#allocation6], 1 }
 0x10b   :  { %285 = vsyncpa [#allocation9], 1 }
 0x10c   :  { %286 = vsyncpa [#allocation4], 1 }

</bundles_post_ra>
